<compile_context>
chip_gen: v7x
topology: tpu7x:2x2x1
jax: 0.10.0
libtpu: 0.0.40
codegen_flags: <defaults>
</compile_context>

<pallas_src>
import functools

import numpy as np
import jax
import jax.numpy as jnp
from jax import lax
from jax.experimental import pallas as pl
from jax.experimental.pallas import tpu as pltpu

_NEG = -1e30  # "minus infinity" for padded logits lanes


def _round_up(x, m):
    return (x + m - 1) // m * m


def _cdiv(a, b):
    return (a + b - 1) // b


def _actor_kernel(h_pad, pad_out, nh_pad, offsets, dims,
                  state_ref, w1_ref, w2_ref, wh_ref, bias_ref,
                  seg_ref, segt_ref, out_ref):
    """Fused trunk + fused multi-head (segmented) softmax.

    state_ref: [TB, state_dim]          (f32)
    w1_ref:    [state_dim, h_pad]       (bf16/f32)
    w2_ref:    [h_pad, h_pad]           (bf16/f32)
    wh_ref:    [h_pad, pad_out]         (bf16/f32, fused + zero-padded heads)
    bias_ref:  [4, BW]  f32 rows = b1, b2, fused head bias (pad lanes -1e30),
                              guard row (1.0 on padded head columns)
    seg_ref:   [pad_out, nh_pad]  f32 one-hot lane->head segment matrix
    segt_ref:  [nh_pad, pad_out]  f32 transpose of seg_ref
    out_ref:   [TB, pad_out]      lane-dense probability slab
    """
    cdt = w1_ref.dtype  # matmul input dtype (bf16 on the fast MXU path)

    bias = bias_ref[...]                       # (4, BW) f32
    b1 = bias[0:1, :h_pad]                     # (1, h_pad)
    b2 = bias[1:2, :h_pad]                     # (1, h_pad)
    bh = bias[2:3, :pad_out]                   # (1, pad_out); pad lanes = -1e30
    guard = bias[3:4, :nh_pad]                 # (1, nh_pad); 1.0 on padded head cols

    # ---- actor trunk: Linear -> tanh -> Linear -> tanh (MXU, f32 accumulate) ----
    x = state_ref[...].astype(cdt)
    h = jnp.tanh(jnp.dot(x, w1_ref[...], preferred_element_type=jnp.float32) + b1)
    h = jnp.tanh(
        jnp.dot(h.astype(cdt), w2_ref[...], preferred_element_type=jnp.float32) + b2
    )

    # ---- all heads in one matmul; padded lanes carry a -1e30 bias ----
    logits = (
        jnp.dot(h.astype(cdt), wh_ref[...], preferred_element_type=jnp.float32) + bh
    )

    # ---- per-head max (exact; a global row max could underflow a whole head) ----
    lane = lax.broadcasted_iota(jnp.int32, (1, pad_out), 1)
    m_bcast = jnp.zeros_like(logits)
    for off, d in zip(offsets, dims):
        mask = (lane >= off) & (lane < off + d)       # static head window
        m_k = jnp.max(jnp.where(mask, logits, _NEG), axis=-1, keepdims=True)
        m_bcast = jnp.where(mask, m_k, m_bcast)

    # padded lanes: exp(-1e30 - 0) underflows to exactly 0
    e = jnp.exp(logits - m_bcast)

    # ---- segmented sum + broadcast on the MXU (frees the VALU/XLU) ----
    # s[:, k] = sum of e over head k's lanes; guard makes padded head cols 1.0
    s = jnp.dot(e, seg_ref[...], preferred_element_type=jnp.float32) + guard
    r0 = pl.reciprocal(s, approx=True)                 # EUP vrcp (free slot)
    inv = r0 * (2.0 - s * r0)                          # one Newton step -> ~f32 accurate
    # broadcast 1/s_k back to every lane of head k (padded lanes get exactly 0)
    inv_b = jnp.dot(inv, segt_ref[...], preferred_element_type=jnp.float32)

    out_ref[...] = (e * inv_b).astype(out_ref.dtype)


def pack_params(params, action_dims, *, weight_dtype=jnp.bfloat16):
    """One-time host-side packing: fuse heads, pad hidden to 128, build segment mats."""
    action_dims = tuple(int(d) for d in action_dims)
    n_heads = len(action_dims)
    state_dim, hidden = params["w1"].shape

    h_pad = _round_up(hidden, 128)
    total = sum(action_dims)
    pad_out = _round_up(total, 128)
    nh_pad = _round_up(n_heads, 128)
    bw = max(h_pad, pad_out, nh_pad)

    offsets = []
    off = 0
    for d in action_dims:
        offsets.append(off)
        off += d

    # hidden padded with zeros everywhere -> padded h columns stay exactly tanh(0)=0
    w1 = jnp.pad(params["w1"], ((0, 0), (0, h_pad - hidden))).astype(weight_dtype)
    w2 = jnp.pad(params["w2"],
                 ((0, h_pad - hidden), (0, h_pad - hidden))).astype(weight_dtype)

    wh = jnp.concatenate([params["head_w"][k] for k in range(n_heads)], axis=1)
    wh = jnp.pad(wh, ((0, h_pad - hidden), (0, pad_out - total))).astype(weight_dtype)

    bh = jnp.concatenate(
        [params["head_b"][k].reshape(1, -1) for k in range(n_heads)], axis=1)
    bh = jnp.pad(bh, ((0, 0), (0, pad_out - total)), constant_values=_NEG)

    bias = jnp.zeros((4, bw), jnp.float32)
    bias = bias.at[0, :hidden].set(params["b1"].reshape(-1))
    bias = bias.at[1, :hidden].set(params["b2"].reshape(-1))
    bias = bias.at[2, :pad_out].set(bh.reshape(-1))
    bias = bias.at[3, n_heads:nh_pad].set(1.0)          # guard for padded head cols

    lane = jnp.arange(pad_out)
    seg = jnp.stack(
        [((lane >= o) & (lane < o + d)).astype(jnp.float32)
         for o, d in zip(offsets, action_dims)], axis=1)       # [pad_out, n_heads]
    seg = jnp.pad(seg, ((0, 0), (0, nh_pad - n_heads)))        # [pad_out, nh_pad]
    seg_t = jnp.asarray(seg.T)                                 # [nh_pad, pad_out]

    return dict(w1=w1, w2=w2, wh=wh, bias=bias, seg=seg, seg_t=seg_t)


def promp_model_forward(state, packed, *, action_dims, out_dtype=jnp.bfloat16,
                        tb_max=1024, return_packed=False):
    """Fused forward pass.

    Returns the list of per-head softmax probs [B, dim_k] (module parity), or the
    contiguous [B, sum(dims)] slab when return_packed=True (avoids per-head
    re-slicing of the HBM slab at the consumer).
    """
    action_dims = tuple(int(d) for d in action_dims)
    B, state_dim = state.shape
    h_pad = packed["w1"].shape[1]
    pad_out = packed["wh"].shape[1]
    nh_pad = packed["seg"].shape[1]
    bw = packed["bias"].shape[1]
    total = sum(action_dims)

    offsets = []
    off = 0
    for d in action_dims:
        offsets.append(off)
        off += d
    offsets = tuple(offsets)

    # ---- batch tiling: balanced tiles (minimal padding); >=2 grid steps when
    # B > 8 so v7x's two TensorCores both get work under ("parallel",) ----
    n_tiles = max(_cdiv(B, tb_max), 2 if B > 8 else 1)
    tb = _round_up(_cdiv(B, n_tiles), 8)
    grid_n = _cdiv(B, tb)
    b_pad = grid_n * tb
    state_p = jnp.pad(state, ((0, b_pad - B), (0, 0))) if b_pad != B else state

    # ---- explicit scoped-VMEM limit only when large hidden would blow the
    # v5e 16 MiB / default scoped limit (harmless no-op for small configs) ----
    out_isize = np.dtype(out_dtype).itemsize
    weight_bytes = sum(int(packed[k].size) * packed[k].dtype.itemsize
                       for k in ("w1", "w2", "wh", "bias", "seg", "seg_t"))
    step_bytes = 2 * (tb * state_dim * 4 + tb * pad_out * out_isize)  # dbl-buffered tiles
    scratch_bytes = 8 * tb * pad_out * 4                              # f32 intermediates
    est = weight_bytes + step_bytes + scratch_bytes + (2 << 20)
    vmem_limit = None if est < (28 << 20) else min(int(est), 64 << 20)

    kernel = functools.partial(_actor_kernel, h_pad, pad_out, nh_pad,
                               offsets, action_dims)
    invariant = dict(pipeline_mode=pl.Buffered(1))  # weights never change per step

    slab = pl.pallas_call(
        kernel,
        out_shape=jax.ShapeDtypeStruct((b_pad, pad_out), out_dtype),
        grid=(grid_n,),
        in_specs=[
            pl.BlockSpec((tb, state_dim), lambda i: (i, 0)),
            pl.BlockSpec((state_dim, h_pad), lambda i: (0, 0), **invariant),
            pl.BlockSpec((h_pad, h_pad), lambda i: (0, 0), **invariant),
            pl.BlockSpec((h_pad, pad_out), lambda i: (0, 0), **invariant),
            pl.BlockSpec((4, bw), lambda i: (0, 0), **invariant),
            pl.BlockSpec((pad_out, nh_pad), lambda i: (0, 0), **invariant),
            pl.BlockSpec((nh_pad, pad_out), lambda i: (0, 0), **invariant),
        ],
        out_specs=pl.BlockSpec((tb, pad_out), lambda i: (i, 0)),
        compiler_params=pltpu.CompilerParams(
            dimension_semantics=("parallel",),   # v7x: split batch across both TCs
            vmem_limit_bytes=vmem_limit,
        ),
    )(state_p, packed["w1"], packed["w2"], packed["wh"], packed["bias"],
      packed["seg"], packed["seg_t"])

    slab = slab[:B]
    if return_packed:
        return slab[:, :total]
    # keep the split inside the same jit as the consumer so XLA can fuse it
    return [slab[:, o:o + d] for o, d in zip(offsets, action_dims)]


def init_params(key, state_dim, action_dims, hidden_size):
    """Deterministic parameter init (uniform, PyTorch-Linear-like scale)."""
    keys = jax.random.split(key, 4 + 2 * len(action_dims))

    def linear(kw, kb, fan_in, fan_out):
        bound = 1.0 / jnp.sqrt(jnp.float32(fan_in))
        w = jax.random.uniform(kw, (fan_in, fan_out), jnp.float32, -bound, bound)
        b = jax.random.uniform(kb, (1, fan_out), jnp.float32, -bound, bound)
        return w, b

    w1, b1 = linear(keys[0], keys[1], state_dim, hidden_size)
    w2, b2 = linear(keys[2], keys[3], hidden_size, hidden_size)
    head_w, head_b = [], []
    for i, d in enumerate(action_dims):
        w, b = linear(keys[4 + 2 * i], keys[5 + 2 * i], hidden_size, d)
        head_w.append(w)
        head_b.append(b)
    return dict(w1=w1, b1=b1, w2=w2, b2=b2, head_w=head_w, head_b=head_b)


def reference_forward(state, params, weight_dtype=jnp.bfloat16):
    """Pure-JAX reference mirroring the kernel trunk numerics (bf16 dots, f32 softmax)."""
    cdt = weight_dtype
    w1 = params["w1"].astype(cdt)
    w2 = params["w2"].astype(cdt)
    h = jnp.tanh(
        jnp.dot(state.astype(cdt), w1, preferred_element_type=jnp.float32)
        + params["b1"])
    h = jnp.tanh(
        jnp.dot(h.astype(cdt), w2, preferred_element_type=jnp.float32)
        + params["b2"])
    outs = []
    for w, b in zip(params["head_w"], params["head_b"]):
        logits = jnp.dot(h.astype(cdt), w.astype(cdt),
                         preferred_element_type=jnp.float32) + b
        outs.append(jax.nn.softmax(logits, axis=-1))
    return outs


if __name__ == "__main__":
    # Small shapes consistent with the module's forward.
    batch = 8
    state_dim = 16
    hidden_size = 32
    action_dims = (4, 6)

    key = jax.random.PRNGKey(0)
    k_state, k_params = jax.random.split(key)
    state = jax.random.normal(k_state, (batch, state_dim), jnp.float32)
    params = init_params(k_params, state_dim, action_dims, hidden_size)

    # One-time packing (outside the per-step jit).
    packed = pack_params(params, action_dims)

    fwd = jax.jit(functools.partial(promp_model_forward, action_dims=action_dims))
    probs = fwd(state, packed)
    probs = jax.block_until_ready(probs)

    # Validate against a numerics-matched pure-JAX reference (bf16 trunk,
    # f32 softmax).  Output slab is bf16 by default -> tolerances sized for that.
    ref = reference_forward(state, params)
    for p, r, d in zip(probs, ref, action_dims):
        p32 = p.astype(jnp.float32)
        assert p.shape == (batch, d), (p.shape, (batch, d))
        assert jnp.allclose(p32, r, atol=2e-3, rtol=2e-2), "mismatch vs reference"
        assert jnp.allclose(jnp.sum(p32, axis=-1), 1.0, atol=1e-2), "probs not normalized"

    print("KERNEL_OK")
</pallas_src>

<mosaic_0001>
module attributes {stable_mosaic.version = 11 : i64} {
  func.func @_actor_kernel(%arg0: i32, %arg1: memref<8x16xf32, #tpu.memory_space<vmem>>, %arg2: memref<16x128xbf16, #tpu.memory_space<vmem>>, %arg3: memref<128x128xbf16, #tpu.memory_space<vmem>>, %arg4: memref<128x128xbf16, #tpu.memory_space<vmem>>, %arg5: memref<4x128xf32, #tpu.memory_space<vmem>>, %arg6: memref<128x128xf32, #tpu.memory_space<vmem>>, %arg7: memref<128x128xf32, #tpu.memory_space<vmem>>, %arg8: memref<8x128xbf16, #tpu.memory_space<vmem>>) attributes {dimension_semantics = [#tpu.dimension_semantics<parallel>], iteration_bounds = array<i64: 1>, scalar_prefetch = 0 : i64, scratch_operands = 0 : i64, tpu.core_type = #tpu.core_type<tc>, window_params = [{transform_indices = @transform_0, window_bounds = array<i64: 8, 16>}, {pipeline_mode = #tpu.pipeline_mode<synchronous>, transform_indices = @transform_1, window_bounds = array<i64: 16, 128>}, {pipeline_mode = #tpu.pipeline_mode<synchronous>, transform_indices = @transform_2, window_bounds = array<i64: 128, 128>}, {pipeline_mode = #tpu.pipeline_mode<synchronous>, transform_indices = @transform_3, window_bounds = array<i64: 128, 128>}, {pipeline_mode = #tpu.pipeline_mode<synchronous>, transform_indices = @transform_4, window_bounds = array<i64: 4, 128>}, {pipeline_mode = #tpu.pipeline_mode<synchronous>, transform_indices = @transform_5, window_bounds = array<i64: 128, 128>}, {pipeline_mode = #tpu.pipeline_mode<synchronous>, transform_indices = @transform_6, window_bounds = array<i64: 128, 128>}, {transform_indices = @transform_7, window_bounds = array<i64: 8, 128>}]} {
    %c0 = arith.constant 0 : index
    %c0_0 = arith.constant 0 : index
    %0 = vector.load %arg5[%c0, %c0_0] : memref<4x128xf32, #tpu.memory_space<vmem>>, vector<4x128xf32>
    %1 = vector.extract_strided_slice %0 {offsets = [0, 0], sizes = [1, 128], strides = [1, 1]} : vector<4x128xf32> to vector<1x128xf32>
    %2 = vector.extract_strided_slice %0 {offsets = [1, 0], sizes = [1, 128], strides = [1, 1]} : vector<4x128xf32> to vector<1x128xf32>
    %3 = vector.extract_strided_slice %0 {offsets = [2, 0], sizes = [1, 128], strides = [1, 1]} : vector<4x128xf32> to vector<1x128xf32>
    %4 = vector.extract_strided_slice %0 {offsets = [3, 0], sizes = [1, 128], strides = [1, 1]} : vector<4x128xf32> to vector<1x128xf32>
    %c0_1 = arith.constant 0 : index
    %c0_2 = arith.constant 0 : index
    %5 = vector.load %arg1[%c0_1, %c0_2] : memref<8x16xf32, #tpu.memory_space<vmem>>, vector<8x16xf32>
    %6 = arith.truncf %5 : vector<8x16xf32> to vector<8x16xbf16>
    %c0_3 = arith.constant 0 : index
    %c0_4 = arith.constant 0 : index
    %7 = vector.load %arg2[%c0_3, %c0_4] : memref<16x128xbf16, #tpu.memory_space<vmem>>, vector<16x128xbf16>
    %cst = arith.constant dense<0.000000e+00> : vector<8x128xf32>
    %8 = tpu.matmul %6, %7, %cst {dimension_numbers = #tpu.dot_dimension_numbers<[1], [0], [0], [1], [0, 0, 1, 1], [], []>} : vector<8x16xbf16>, vector<16x128xbf16>, vector<8x128xf32> -> vector<8x128xf32>
    %9 = vector.broadcast %1 : vector<1x128xf32> to vector<8x128xf32>
    %10 = arith.addf %8, %9 : vector<8x128xf32>
    %11 = math.tanh %10 : vector<8x128xf32>
    %12 = arith.truncf %11 : vector<8x128xf32> to vector<8x128xbf16>
    %c0_5 = arith.constant 0 : index
    %c0_6 = arith.constant 0 : index
    %13 = vector.load %arg3[%c0_5, %c0_6] : memref<128x128xbf16, #tpu.memory_space<vmem>>, vector<128x128xbf16>
    %cst_7 = arith.constant dense<0.000000e+00> : vector<8x128xf32>
    %14 = tpu.matmul %12, %13, %cst_7 {dimension_numbers = #tpu.dot_dimension_numbers<[1], [0], [0], [1], [0, 0, 1, 1], [], []>} : vector<8x128xbf16>, vector<128x128xbf16>, vector<8x128xf32> -> vector<8x128xf32>
    %15 = vector.broadcast %2 : vector<1x128xf32> to vector<8x128xf32>
    %16 = arith.addf %14, %15 : vector<8x128xf32>
    %17 = math.tanh %16 : vector<8x128xf32>
    %18 = arith.truncf %17 : vector<8x128xf32> to vector<8x128xbf16>
    %c0_8 = arith.constant 0 : index
    %c0_9 = arith.constant 0 : index
    %19 = vector.load %arg4[%c0_8, %c0_9] : memref<128x128xbf16, #tpu.memory_space<vmem>>, vector<128x128xbf16>
    %cst_10 = arith.constant dense<0.000000e+00> : vector<8x128xf32>
    %20 = tpu.matmul %18, %19, %cst_10 {dimension_numbers = #tpu.dot_dimension_numbers<[1], [0], [0], [1], [0, 0, 1, 1], [], []>} : vector<8x128xbf16>, vector<128x128xbf16>, vector<8x128xf32> -> vector<8x128xf32>
    %21 = vector.broadcast %3 : vector<1x128xf32> to vector<8x128xf32>
    %22 = arith.addf %20, %21 : vector<8x128xf32>
    %23 = tpu.iota {dimensions = array<i32: 1>} : vector<1x128xi32>
    %cst_11 = arith.constant 0.000000e+00 : f32
    %24 = vector.broadcast %cst_11 : f32 to vector<8x128xf32>
    %c0_i32 = arith.constant 0 : i32
    %25 = vector.broadcast %c0_i32 : i32 to vector<1x128xi32>
    %26 = arith.cmpi sge, %23, %25 : vector<1x128xi32>
    %c4_i32 = arith.constant 4 : i32
    %27 = vector.broadcast %c4_i32 : i32 to vector<1x128xi32>
    %28 = arith.cmpi slt, %23, %27 : vector<1x128xi32>
    %29 = arith.andi %26, %28 : vector<1x128xi1>
    %cst_12 = arith.constant -1.000000e+30 : f32
    %30 = vector.shape_cast %29 : vector<1x128xi1> to vector<1x128xi1>
    %31 = vector.broadcast %30 : vector<1x128xi1> to vector<8x128xi1>
    %32 = vector.broadcast %cst_12 : f32 to vector<8x128xf32>
    %33 = arith.select %31, %22, %32 : vector<8x128xi1>, vector<8x128xf32>
    %cst_13 = arith.constant dense<0xFF800000> : vector<8xf32>
    %34 = vector.multi_reduction <maximumf>, %33, %cst_13 [1] : vector<8x128xf32> to vector<8xf32>
    %35 = vector.shape_cast %34 : vector<8xf32> to vector<8x1xf32>
    %36 = vector.shape_cast %29 : vector<1x128xi1> to vector<1x128xi1>
    %37 = vector.broadcast %36 : vector<1x128xi1> to vector<8x128xi1>
    %38 = vector.shape_cast %35 : vector<8x1xf32> to vector<8x1xf32>
    %39 = vector.broadcast %38 : vector<8x1xf32> to vector<8x128xf32>
    %40 = arith.select %37, %39, %24 : vector<8x128xi1>, vector<8x128xf32>
    %c4_i32_14 = arith.constant 4 : i32
    %41 = vector.broadcast %c4_i32_14 : i32 to vector<1x128xi32>
    %42 = arith.cmpi sge, %23, %41 : vector<1x128xi32>
    %c10_i32 = arith.constant 10 : i32
    %43 = vector.broadcast %c10_i32 : i32 to vector<1x128xi32>
    %44 = arith.cmpi slt, %23, %43 : vector<1x128xi32>
    %45 = arith.andi %42, %44 : vector<1x128xi1>
    %cst_15 = arith.constant -1.000000e+30 : f32
    %46 = vector.shape_cast %45 : vector<1x128xi1> to vector<1x128xi1>
    %47 = vector.broadcast %46 : vector<1x128xi1> to vector<8x128xi1>
    %48 = vector.broadcast %cst_15 : f32 to vector<8x128xf32>
    %49 = arith.select %47, %22, %48 : vector<8x128xi1>, vector<8x128xf32>
    %cst_16 = arith.constant dense<0xFF800000> : vector<8xf32>
    %50 = vector.multi_reduction <maximumf>, %49, %cst_16 [1] : vector<8x128xf32> to vector<8xf32>
    %51 = vector.shape_cast %50 : vector<8xf32> to vector<8x1xf32>
    %52 = vector.shape_cast %45 : vector<1x128xi1> to vector<1x128xi1>
    %53 = vector.broadcast %52 : vector<1x128xi1> to vector<8x128xi1>
    %54 = vector.shape_cast %51 : vector<8x1xf32> to vector<8x1xf32>
    %55 = vector.broadcast %54 : vector<8x1xf32> to vector<8x128xf32>
    %56 = arith.select %53, %55, %40 : vector<8x128xi1>, vector<8x128xf32>
    %57 = arith.subf %22, %56 : vector<8x128xf32>
    %58 = math.exp %57 : vector<8x128xf32>
    %c0_17 = arith.constant 0 : index
    %c0_18 = arith.constant 0 : index
    %59 = vector.load %arg6[%c0_17, %c0_18] : memref<128x128xf32, #tpu.memory_space<vmem>>, vector<128x128xf32>
    %cst_19 = arith.constant dense<0.000000e+00> : vector<8x128xf32>
    %60 = tpu.matmul %58, %59, %cst_19 {dimension_numbers = #tpu.dot_dimension_numbers<[1], [0], [0], [1], [0, 0, 1, 1], [], []>} : vector<8x128xf32>, vector<128x128xf32>, vector<8x128xf32> -> vector<8x128xf32>
    %61 = vector.broadcast %4 : vector<1x128xf32> to vector<8x128xf32>
    %62 = arith.addf %60, %61 : vector<8x128xf32>
    %63 = tpu.reciprocal %62 {approx = true} : vector<8x128xf32> -> vector<8x128xf32>
    %64 = arith.mulf %62, %63 : vector<8x128xf32>
    %cst_20 = arith.constant 2.000000e+00 : f32
    %65 = vector.broadcast %cst_20 : f32 to vector<8x128xf32>
    %66 = arith.subf %65, %64 : vector<8x128xf32>
    %67 = arith.mulf %63, %66 : vector<8x128xf32>
    %c0_21 = arith.constant 0 : index
    %c0_22 = arith.constant 0 : index
    %68 = vector.load %arg7[%c0_21, %c0_22] : memref<128x128xf32, #tpu.memory_space<vmem>>, vector<128x128xf32>
    %cst_23 = arith.constant dense<0.000000e+00> : vector<8x128xf32>
    %69 = tpu.matmul %67, %68, %cst_23 {dimension_numbers = #tpu.dot_dimension_numbers<[1], [0], [0], [1], [0, 0, 1, 1], [], []>} : vector<8x128xf32>, vector<128x128xf32>, vector<8x128xf32> -> vector<8x128xf32>
    %70 = arith.mulf %58, %69 : vector<8x128xf32>
    %71 = arith.truncf %70 : vector<8x128xf32> to vector<8x128xbf16>
    %c0_24 = arith.constant 0 : index
    %c0_25 = arith.constant 0 : index
    %72 = vector.load %arg8[%c0_24, %c0_25] : memref<8x128xbf16, #tpu.memory_space<vmem>>, vector<8x128xbf16>
    tpu.vector_store %arg8[%c0_24, %c0_25], %71 {strides = array<i32>} : memref<8x128xbf16, #tpu.memory_space<vmem>>, vector<8x128xbf16>,
    return
  }
  func.func @transform_0(%arg0: i32) -> (i32, i32) {
    %c0_i32 = arith.constant 0 : i32
    %c0_i32_0 = arith.constant 0 : i32
    return %arg0, %c0_i32 : i32, i32
  }
  func.func @transform_1(%arg0: i32) -> (i32, i32) {
    %c0_i32 = arith.constant 0 : i32
    %c0_i32_0 = arith.constant 0 : i32
    %c0_i32_1 = arith.constant 0 : i32
    return %c0_i32, %c0_i32_0 : i32, i32
  }
  func.func @transform_2(%arg0: i32) -> (i32, i32) {
    %c0_i32 = arith.constant 0 : i32
    %c0_i32_0 = arith.constant 0 : i32
    %c0_i32_1 = arith.constant 0 : i32
    return %c0_i32, %c0_i32_0 : i32, i32
  }
  func.func @transform_3(%arg0: i32) -> (i32, i32) {
    %c0_i32 = arith.constant 0 : i32
    %c0_i32_0 = arith.constant 0 : i32
    %c0_i32_1 = arith.constant 0 : i32
    return %c0_i32, %c0_i32_0 : i32, i32
  }
  func.func @transform_4(%arg0: i32) -> (i32, i32) {
    %c0_i32 = arith.constant 0 : i32
    %c0_i32_0 = arith.constant 0 : i32
    %c0_i32_1 = arith.constant 0 : i32
    return %c0_i32, %c0_i32_0 : i32, i32
  }
  func.func @transform_5(%arg0: i32) -> (i32, i32) {
    %c0_i32 = arith.constant 0 : i32
    %c0_i32_0 = arith.constant 0 : i32
    %c0_i32_1 = arith.constant 0 : i32
    return %c0_i32, %c0_i32_0 : i32, i32
  }
  func.func @transform_6(%arg0: i32) -> (i32, i32) {
    %c0_i32 = arith.constant 0 : i32
    %c0_i32_0 = arith.constant 0 : i32
    %c0_i32_1 = arith.constant 0 : i32
    return %c0_i32, %c0_i32_0 : i32, i32
  }
  func.func @transform_7(%arg0: i32) -> (i32, i32) {
    %c0_i32 = arith.constant 0 : i32
    %c0_i32_0 = arith.constant 0 : i32
    return %arg0, %c0_i32 : i32, i32
  }
}

</mosaic_0001>

<bundles_post_ra>
// kernel: promp_model_forward.1
= control target key start
LH: loop header
LB: loop body
LE: loop exit
PB: predicated region body
PF: predicated region fallthrough
CT: control target
= control target key end

     0   :  { %12 = vsyncpa [#allocation3], 0  ;;  %s1214_s0 = inlined_call_operand.hbm [shape: f32[8,16], index: 0, kind: input, shape index: {}]   ;;  %s1215_s1 = inlined_call_operand.vmem [shape: bf16[16,128], index: 1, kind: input, shape index: {}]   ;;  %s1216_s2 = inlined_call_operand.hbm [shape: bf16[128,128], index: 2, kind: input, shape index: {}]   ;;  %s1217_s3 = inlined_call_operand.hbm [shape: bf16[128,128], index: 3, kind: input, shape index: {}]   ;;  %s1218_s4 = inlined_call_operand.hbm [shape: f32[4,128], index: 4, kind: input, shape index: {}]   ;;  %s1219_s5 = inlined_call_operand.hbm [shape: f32[128,128], index: 5, kind: input, shape index: {}]   ;;  %s1220_s6 = inlined_call_operand.hbm [shape: f32[128,128], index: 6, kind: input, shape index: {}]   ;;  %s1221_s7 = inlined_call_operand.vmem [shape: bf16[8,128], index: 7, kind: output, shape index: {}]  }
   0x1   :  { %13 = vsyncpa [#allocation5], 0 }
   0x2   :  { %14 = vsyncpa [#allocation8], 0 }
   0x3   :  { %15 = vsyncpa [#allocation11], 0  ;;  %s1012_s24 = smov [#allocation4]   ;;  %s872_s28 = scalar_lea.hbm %s1216_s2, 1024 }
   0x4   :  { %s33_s25 = sshll.u32 %s1012_s24, 4  ;;  %p873_p0 = scmp.ne.s32.totalorder %s1216_s2, %s872_s28  ;;  %s34_s25 = int_to_ptr.vmem [resolvable:$true] %s33_s25 }
   0x5   :  { %p876_p1 = scmp.lt.u32.totalorder %s872_s28, %s1216_s2 }
   0x7   :  { %p878_p2 = pnand %p876_p1, %p873_p0 }
   0x9   :  { %881 = shalt.err (!%p878_p2)
}
   0xa   :  { %s882_s10 = scalar_lea.vmem %s34_s25, 1024  ;;  %p887_p4 = scmp.lt.s32.totalorder %s34_s25, %s34_s25 }
   0xb   :  { %p883_p3 = scmp.ne.s32.totalorder %s34_s25, %s882_s10  ;;  %p888_p5 = scmp.lt.s32.totalorder %s882_s10, %s882_s10 }
   0xd   :  { %p889_p6 = por %p888_p5, %p887_p4 }
   0xf   :  { %p890_p7 = pnand %p889_p6, %p883_p3 }
  0x11   :  { %893 = shalt.err (!%p890_p7)
}
  0x12   :  { %s1013_s11 = smov 64   ;;  %s1014_s12 = smov 4  }
  0x13   :  { %39 = dma.hbm_to_vmem [thread:$0]  %s1216_s2, 1024, %s34_s25, [#allocation5], %s1013_s11, %s1013_s11, %s1014_s12  }
  0x14   :  { %s1015_s15 = smov [#allocation7]   ;;  %s1016_s17 = smov [#allocation2]  }
  0x15   :  { %s58_s16 = sshll.u32 %s1015_s15, 4  ;;  %s22_s18 = sshll.u32 %s1016_s17, 4  ;;  %s59_s16 = int_to_ptr.vmem [resolvable:$true] %s58_s16  ;;  %s23_s18 = int_to_ptr.vmem [resolvable:$true] %s22_s18 }
  0x16   :  { %s894_s21 = scalar_lea.hbm %s1218_s4, 64 }
  0x17   :  { %p895_p8 = scmp.ne.s32.totalorder %s1218_s4, %s894_s21  ;;  %p898_p9 = scmp.lt.u32.totalorder %s894_s21, %s1218_s4 }
  0x19   :  { %p900_p10 = pnand %p898_p9, %p895_p8 }
  0x1b   :  { %903 = shalt.err (!%p900_p10)
}
  0x1c   :  { %s904_s2 = scalar_lea.vmem %s59_s16, 64  ;;  %p909_p12 = scmp.lt.s32.totalorder %s59_s16, %s59_s16 }
  0x1d   :  { %p905_p11 = scmp.ne.s32.totalorder %s59_s16, %s904_s2  ;;  %p910_p13 = scmp.lt.s32.totalorder %s904_s2, %s904_s2 }
  0x1f   :  { %p911_p0 = por %p910_p13, %p909_p12 }
  0x21   :  { %p912_p1 = pnand %p911_p0, %p905_p11 }
  0x23   :  { %915 = shalt.err (!%p912_p1)
}
  0x24   :  { %61 = dma.hbm_to_vmem [thread:$0]  %s1218_s4, 64, %s59_s16, [#allocation8]  }
  0x25   :  { %s916_s30 = scalar_lea.hbm %s1214_s0, 128 }
  0x26   :  { %p917_p2 = scmp.ne.s32.totalorder %s1214_s0, %s916_s30  ;;  %p920_p3 = scmp.lt.u32.totalorder %s916_s30, %s1214_s0 }
  0x28   :  { %p922_p4 = pnand %p920_p3, %p917_p2 }
  0x2a   :  { %925 = shalt.err (!%p922_p4)
}
  0x2b   :  { %s926_s14 = scalar_lea.vmem %s23_s18, 128  ;;  %p931_p6 = scmp.lt.s32.totalorder %s23_s18, %s23_s18 }
  0x2c   :  { %p927_p5 = scmp.ne.s32.totalorder %s23_s18, %s926_s14  ;;  %p932_p7 = scmp.lt.s32.totalorder %s926_s14, %s926_s14 }
  0x2e   :  { %p933_p8 = por %p932_p7, %p931_p6 }
  0x30   :  { %p934_p9 = pnand %p933_p8, %p927_p5 }
  0x32   :  { %937 = shalt.err (!%p934_p9)
}
  0x33   :  { %25 = dma.hbm_to_vmem [thread:$0]  %s1214_s0, 128, %s23_s18, [#allocation3]  }
  0x34   :  { %s1017_s16 = smov [#allocation6]   ;;  %s1018_s19 = smov [#allocation9]  }
  0x35   :  { %s45_s17 = sshll.u32 %s1017_s16, 4  ;;  %s67_s20 = sshll.u32 %s1018_s19, 4  ;;  %s46_s17 = int_to_ptr.vmem [resolvable:$true] %s45_s17  ;;  %s68_s20 = int_to_ptr.vmem [resolvable:$true] %s67_s20 }
  0x36   :  { %s938_s23 = scalar_lea.hbm %s1217_s3, 1024 }
  0x37   :  { %p939_p10 = scmp.ne.s32.totalorder %s1217_s3, %s938_s23  ;;  %p942_p11 = scmp.lt.u32.totalorder %s938_s23, %s1217_s3 }
  0x39   :  { %p944_p12 = pnand %p942_p11, %p939_p10 }
  0x3b   :  { %947 = shalt.err (!%p944_p12)
}
  0x3c   :  { %s948_s0 = scalar_lea.vmem %s46_s17, 1024  ;;  %p953_p0 = scmp.lt.s32.totalorder %s46_s17, %s46_s17 }
  0x3d   :  { %p949_p13 = scmp.ne.s32.totalorder %s46_s17, %s948_s0  ;;  %p954_p1 = scmp.lt.s32.totalorder %s948_s0, %s948_s0 }
  0x3f   :  { %p955_p2 = por %p954_p1, %p953_p0 }
  0x41   :  { %p956_p3 = pnand %p955_p2, %p949_p13 }
  0x43   :  { %959 = shalt.err (!%p956_p3)
}
  0x44   :  { %51 = dma.hbm_to_vmem [thread:$0]  %s1217_s3, 1024, %s46_s17, [#allocation5], %s1013_s11, %s1013_s11, %s1014_s12  }
  0x45   :  { %s960_s30 = scalar_lea.hbm %s1219_s5, 2048 }
  0x46   :  { %p961_p4 = scmp.ne.s32.totalorder %s1219_s5, %s960_s30  ;;  %p964_p5 = scmp.lt.u32.totalorder %s960_s30, %s1219_s5 }
  0x48   :  { %p966_p6 = pnand %p964_p5, %p961_p4 }
  0x4a   :  { %969 = shalt.err (!%p966_p6)
}
  0x4b   :  { %s970_s14 = scalar_lea.vmem %s68_s20, 2048  ;;  %p975_p8 = scmp.lt.s32.totalorder %s68_s20, %s68_s20 }
  0x4c   :  { %p971_p7 = scmp.ne.s32.totalorder %s68_s20, %s970_s14  ;;  %p976_p9 = scmp.lt.s32.totalorder %s970_s14, %s970_s14 }
  0x4e   :  { %p977_p10 = por %p976_p9, %p975_p8 }
  0x50   :  { %p978_p11 = pnand %p977_p10, %p971_p7 }
  0x52   :  { %981 = shalt.err (!%p978_p11)
}
  0x53   :  { %s1019_s3 = smov 128   ;;  %s1020_s11 = smov 8  }
  0x54   :  { %73 = dma.hbm_to_vmem [thread:$0]  %s1219_s5, 2048, %s68_s20, [#allocation8], %s1019_s3, %s1019_s3, %s1020_s11  }
  0x55   :  { %s1021_s15 = smov [#allocation10]   ;;  %s982_s21 = scalar_lea.hbm %s1220_s6, 2048 }
  0x56   :  { %s79_s16 = sshll.u32 %s1021_s15, 4  ;;  %p983_p12 = scmp.ne.s32.totalorder %s1220_s6, %s982_s21  ;;  %s80_s16 = int_to_ptr.vmem [resolvable:$true] %s79_s16 }
  0x57   :  { %p986_p13 = scmp.lt.u32.totalorder %s982_s21, %s1220_s6 }
  0x59   :  { %p988_p0 = pnand %p986_p13, %p983_p12 }
  0x5b   :  { %991 = shalt.err (!%p988_p0)
}
  0x5c   :  { %s992_s2 = scalar_lea.vmem %s80_s16, 2048  ;;  %p997_p2 = scmp.lt.s32.totalorder %s80_s16, %s80_s16 }
  0x5d   :  { %p993_p1 = scmp.ne.s32.totalorder %s80_s16, %s992_s2  ;;  %p998_p3 = scmp.lt.s32.totalorder %s992_s2, %s992_s2 }
  0x5f   :  { %p999_p4 = por %p998_p3, %p997_p2 }
  0x61   :  { %p1000_p5 = pnand %p999_p4, %p993_p1 }
  0x63   :  { %1003 = shalt.err (!%p1000_p5)
}
  0x64   :  { %85 = dma.hbm_to_vmem [thread:$0]  %s1220_s6, 2048, %s80_s16, [#allocation11], %s1019_s3, %s1019_s3, %s1020_s11  }
  0x65   :  { %1004 = dma.done.wait [#allocation3], 128  }
  0x66   :  { %1005 = vsyncadd [#allocation3], 4294967168 }
  0x67   :  { %1006 = dma.done.wait [#allocation5], 2048  }
  0x68   :  { %1007 = vsyncadd [#allocation5], 4294965248 }
  0x69   :  { %1008 = dma.done.wait [#allocation8], 2112  }
  0x6a   :  { %1009 = vsyncadd [#allocation8], 4294965184 }
  0x6b   :  { %1010 = dma.done.wait [#allocation11], 2048  }
  0x6c   :  { %1011 = vsyncadd [#allocation11], 4294965248  ;;  %v1022_v0 = vmov 0.0   ;;  %vm1023_vm0 = vmmov 0   ;;  %v847_v1 = vld [vmem:[%s1215_s1] sm:$0xff]   ;;  %v106_v2 = vld [vmem:[#allocation2] sm:$0xff]  ;;  %v110_v16 = vlaneseq }
  0x6d   :  { %670 = vmatprep.subr.bf16.mxu0 %v1022_v0  ;;  %672 = vmatprep.mubr.msk.bf16.mxu0 %vm1023_vm0, %v1022_v0  ;;  %v107_v3 = vpack.c.bf16 %v106_v2, %v106_v2  ;;  %vm120_vm1 = vcmask 130048   ;;  %v848_v4 = vld [vmem:[#allocation4] sm:$0xff]   ;;  %v849_v5 = vld [vmem:[#allocation4 + $0x8] sm:$0xff]   ;;  %v850_v6 = vld [vmem:[#allocation4 + $0x10] sm:$0xff]   ;;  %v1024_v44 = vmov 0.0|0.0  }
  0x6e   :  { %676 = vmatprep.subr.bf16.mxu1 %v1022_v0  ;;  %692 = vmatprep.mubr.msk.bf16.mxu1 %vm1023_vm0, %v1022_v0  ;;  %v851_v7 = vld [vmem:[#allocation4 + $0x18] sm:$0xff]   ;;  %v852_v8 = vld [vmem:[#allocation4 + $0x20] sm:$0xff]   ;;  %v853_v9 = vld [vmem:[#allocation4 + $0x28] sm:$0xff]   ;;  %v1166_v17 = vshrl.u32 %v110_v16, 7  ;;  %v385_v52 = vand.u32 127, %v110_v16 }
  0x6f   :  { %671 = vmatpush3.bf16.msra.mxu0 %v847_v1  ;;  %677 = vmatpush3.bf16.msra.mxu1 %v848_v4  ;;  %v854_v10 = vld [vmem:[#allocation4 + $0x30] sm:$0xff]   ;;  %v855_v11 = vld [vmem:[#allocation4 + $0x38] sm:$0xff]   ;;  %v856_v12 = vld [vmem:[#allocation6] sm:$0xff]  }
  0x70   :  { %696 = vmatprep.subr.bf16.mxu0 %v1022_v0  ;;  %678 = vmatprep.subr.bf16.mxu1 %v1022_v0  ;;  %v857_v13 = vld [vmem:[#allocation6 + $0x8] sm:$0xff]   ;;  %v858_v14 = vld [vmem:[#allocation6 + $0x10] sm:$0xff]   ;;  %v859_v15 = vld [vmem:[#allocation6 + $0x18] sm:$0xff]   ;;  %v112_v18 = vsub.s32 0, %v1166_v17  ;;  %v184_v32 = vsub.s32 1, %v1166_v17  ;;  %v294_v51 = vsub.s32 2, %v1166_v17 }
  0x71   :  { %v1169_v19 = vld [vmem:[#allocation7] sm:$0xf]  ;;  %v861_v29 = vld [vmem:[#allocation6 + $0x28] sm:$0xff]   ;;  %v862_v30 = vld [vmem:[#allocation6 + $0x30] sm:$0xff]   ;;  %vm387_vm2 = vcmp.lt.s32.totalorder %v385_v52, 4  ;;  %vm395_vm3 = vcmp.ge.s32.totalorder %v385_v52, 4 }
  0x72   :  { %673 = vmatmul.mubr.msk.bf16.vlgmr.msra.gmra.mrb[0].mxu0 %vm120_vm1, %v107_v3  ;;  %v113_v20 = vrot.slane %v1169_v19, %v112_v18  ;;  %v860_v28 = vld [vmem:[#allocation6 + $0x20] sm:$0xff]   ;;  %v863_v31 = vld [vmem:[#allocation6 + $0x38] sm:$0xff]   ;;  %v185_v33 = vrot.slane %v1169_v19, %v184_v32  ;;  %v408_v42 = vld [vmem:[#allocation9 + $0x8] sm:$0xff]  ;;  %v295_v53 = vrot.slane %v1169_v19, %v294_v51  ;;  %vm396_vm4 = vcmp.lt.s32.totalorder %v385_v52, 10 }
  0x73   :  { %712 = vmatprep.mubr.msk.bf16.mxu0 %vm1023_vm0, %v1022_v0  ;;  %679 = vmatpush3.bf16.msra.mxu1 %v849_v5  ;;  %v407_v41 = vld [vmem:[#allocation9] sm:$0xff]  ;;  %v409_v43 = vld [vmem:[#allocation9 + $0x10] sm:$0xff]  ;;  %v410_v46 = vld [vmem:[#allocation9 + $0x18] sm:$0xff] }
  0x74   :  { %680 = vmatprep.subr.bf16.mxu1 %v1022_v0  ;;  %697 = vmatpush3.bf16.msra.mxu0 %v856_v12  ;;  %v787_v45 = vpack.c.bf16 %v408_v42, %v407_v41  ;;  %v790_v47 = vpack.c.bf16 %v410_v46, %v409_v43  ;;  %v411_v48 = vld [vmem:[#allocation9 + $0x20] sm:$0xff]  ;;  %v412_v49 = vld [vmem:[#allocation9 + $0x28] sm:$0xff]  ;;  %vm1189_vm5 = vmand %vm395_vm3, %vm396_vm4 }
  0x75   :  { %698 = vmatprep.subr.bf16.mxu0 %v1022_v0  ;;  %v793_v50 = vpack.c.bf16 %v412_v49, %v411_v48  ;;  %v413_v62 = vld [vmem:[#allocation9 + $0x30] sm:$0xff]  ;;  %v414_v63 = vld [vmem:[#allocation9 + $0x38] sm:$0xff]  ;;  %v415_v1 = vld [vmem:[#allocation9 + $0x40] sm:$0xff] }
  0x76   :  { %v416_v2 = vld [vmem:[#allocation9 + $0x48] sm:$0xff]  ;;  %v417_v4 = vld [vmem:[#allocation9 + $0x50] sm:$0xff]  ;;  %v418_v5 = vld [vmem:[#allocation9 + $0x58] sm:$0xff] }
  0x77   :  { %681 = vmatpush3.bf16.msra.mxu1 %v850_v6  ;;  %v799_v3 = vpack.c.bf16 %v416_v2, %v415_v1  ;;  %v802_v6 = vpack.c.bf16 %v418_v5, %v417_v4  ;;  %v504_v18 = vld [vmem:[#allocation10 + $0x18] sm:$0xff]  ;;  %v514_v41 = vld [vmem:[#allocation10 + $0x68] sm:$0xff]  ;;  %v515_v43 = vld [vmem:[#allocation10 + $0x70] sm:$0xff] }
  0x78   :  { %682 = vmatprep.subr.bf16.mxu1 %v1022_v0  ;;  %699 = vmatpush3.bf16.msra.mxu0 %v857_v13  ;;  %v501_v13 = vld [vmem:[#allocation10] sm:$0xff]  ;;  %v508_v32 = vld [vmem:[#allocation10 + $0x38] sm:$0xff] }
  0x79   :  { %700 = vmatprep.subr.bf16.mxu0 %v1022_v0 }
  0x7b   :  { %683 = vmatpush3.bf16.msra.mxu1 %v851_v7  ;;  %v419_v7 = vld [vmem:[#allocation9 + $0x60] sm:$0xff] }
  0x7c   :  { %684 = vmatprep.subr.bf16.mxu1 %v1022_v0  ;;  %701 = vmatpush3.bf16.msra.mxu0 %v858_v14  ;;  %v502_v14 = vld [vmem:[#allocation10 + $0x8] sm:$0xff] }
  0x7d   :  { %702 = vmatprep.subr.bf16.mxu0 %v1022_v0  ;;  %v811_v16 = vpack.c.bf16 %v502_v14, %v501_v13 }
  0x7f   :  { %685 = vmatpush3.bf16.msra.mxu1 %v852_v8  ;;  %v420_v8 = vld [vmem:[#allocation9 + $0x68] sm:$0xff] }
  0x80   :  { %686 = vmatprep.subr.bf16.mxu1 %v1022_v0  ;;  %703 = vmatpush3.bf16.msra.mxu0 %v859_v15  ;;  %v503_v15 = vld [vmem:[#allocation10 + $0x10] sm:$0xff] }
  0x81   :  { %704 = vmatprep.subr.bf16.mxu0 %v1022_v0 }
  0x83   :  { %687 = vmatpush3.bf16.msra.mxu1 %v853_v9  ;;  %v805_v9 = vpack.c.bf16 %v420_v8, %v419_v7 }
  0x84   :  { %688 = vmatprep.subr.bf16.mxu1 %v1022_v0  ;;  %705 = vmatpush3.bf16.msra.mxu0 %v860_v28 }
  0x85   :  { %706 = vmatprep.subr.bf16.mxu0 %v1022_v0 }
  0x87   :  { %689 = vmatpush3.bf16.msra.mxu1 %v854_v10  ;;  %v421_v10 = vld [vmem:[#allocation9 + $0x70] sm:$0xff] }
  0x88   :  { %690 = vmatprep.subr.bf16.mxu1 %v1022_v0  ;;  %707 = vmatpush3.bf16.msra.mxu0 %v861_v29 }
  0x89   :  { %708 = vmatprep.subr.bf16.mxu0 %v1022_v0 }
  0x8b   :  { %691 = vmatpush3.bf16.msra.mxu1 %v855_v11  ;;  %v422_v11 = vld [vmem:[#allocation9 + $0x78] sm:$0xff] }
  0x8c   :  { %709 = vmatpush3.bf16.msra.mxu0 %v862_v30  ;;  %786 = vmatprep.subr.bf16.mxu1 %v1024_v44  ;;  %v808_v12 = vpack.c.bf16 %v422_v11, %v421_v10 }
  0x8d   :  { %710 = vmatprep.subr.bf16.mxu0 %v1022_v0 }
  0x90   :  { %711 = vmatpush3.bf16.msra.mxu0 %v863_v31  ;;  %v507_v31 = vld [vmem:[#allocation10 + $0x30] sm:$0xff] }
  0x91   :  { %810 = vmatprep.subr.bf16.mxu0 %v1024_v44 }
 0x145   :  { %v158_v21 = vpop.f32.mrb[0].mxu0 }
 0x146   :  { %v159_v22 = vadd.f32 %v158_v21, %v113_v20  ;;  %v674_v23 = vpop.f32.mrb[1].mxu0  ;;  %v814_v20 = vpack.c.bf16 %v504_v18, %v503_v15  ;;  %v505_v21 = vld [vmem:[#allocation10 + $0x20] sm:$0xff] }
 0x147   :  { %v161_v24 = vpop.f32.mrb[2].mxu0 }
 0x148   :  { %864 = vtanh.f32 %v159_v22  ;;  %v675_v25 = vpop.f32.mrb[3].mxu0  ;;  %v506_v22 = vld [vmem:[#allocation10 + $0x28] sm:$0xff] }
 0x149   :  { %v817_v23 = vpack.c.bf16 %v506_v22, %v505_v21 }
 0x152   :  { %v865_v26 = vpop.eup %864 }
 0x153   :  { %v165_v27 = vpack.c.bf16 %v865_v26, %v865_v26 }
 0x155   :  { %693 = vmatmul.mubr.bf16.vlgmr.msra.gmra.mrb[0].mxu1 %v165_v27 }
 0x156   :  { %748 = vmatprep.mubr.msk.f32.mxu1 %vm1023_vm0, %v1022_v0  ;;  %788 = vmatpush3.bf16.msra.mxu1 %v787_v45  ;;  %v516_v45 = vld [vmem:[#allocation10 + $0x78] sm:$0xff] }
 0x157   :  { %789 = vmatprep.subr.bf16.mxu1 %v1024_v44  ;;  %v832_v46 = vpack.c.bf16 %v516_v45, %v515_v43 }
 0x15a   :  { %791 = vmatpush3.bf16.msra.mxu1 %v790_v47  ;;  %v425_v47 = vsub.s32 3, %v1166_v17 }
 0x15b   :  { %792 = vmatprep.subr.bf16.mxu1 %v1024_v44 }
 0x15c   :  { %v426_v48 = vrot.slane %v1169_v19, %v425_v47 }
 0x15e   :  { %794 = vmatpush3.bf16.msra.mxu1 %v793_v50 }
 0x15f   :  { %795 = vmatprep.subr.bf16.mxu1 %v1024_v44 }
 0x228   :  { %v268_v34 = vpop.f32.mrb[0].mxu1 }
 0x229   :  { %v269_v35 = vadd.f32 %v268_v34, %v185_v33  ;;  %v694_v36 = vpop.f32.mrb[1].mxu1  ;;  %v820_v33 = vpack.c.bf16 %v508_v32, %v507_v31  ;;  %v509_v34 = vld [vmem:[#allocation10 + $0x40] sm:$0xff] }
 0x22a   :  { %v271_v37 = vpop.f32.mrb[2].mxu1 }
 0x22b   :  { %866 = vtanh.f32 %v269_v35  ;;  %v695_v38 = vpop.f32.mrb[3].mxu1  ;;  %v510_v35 = vld [vmem:[#allocation10 + $0x48] sm:$0xff]  ;;  %v511_v37 = vld [vmem:[#allocation10 + $0x50] sm:$0xff] }
 0x22c   :  { %v823_v36 = vpack.c.bf16 %v510_v35, %v509_v34  ;;  %v512_v38 = vld [vmem:[#allocation10 + $0x58] sm:$0xff] }
 0x235   :  { %v867_v39 = vpop.eup %866 }
 0x236   :  { %v275_v40 = vpack.c.bf16 %v867_v39, %v867_v39  ;;  %v826_v39 = vpack.c.bf16 %v512_v38, %v511_v37 }
 0x238   :  { %713 = vmatmul.mubr.bf16.vlgmr.msra.gmra.mrb[4].mxu0 %v275_v40  ;;  %v513_v40 = vld [vmem:[#allocation10 + $0x60] sm:$0xff] }
 0x239   :  { %783 = vmatprep.mubr.msk.f32.mxu0 %vm1023_vm0, %v1022_v0  ;;  %v796_v0 = vpack.c.bf16 %v414_v63, %v413_v62  ;;  %812 = vmatpush3.bf16.msra.mxu0 %v811_v16  ;;  %v829_v42 = vpack.c.bf16 %v514_v41, %v513_v40 }
 0x23a   :  { %813 = vmatprep.subr.bf16.mxu0 %v1024_v44 }
 0x23b   :  { %797 = vmatpush3.bf16.msra.mxu1 %v796_v0 }
 0x23c   :  { %798 = vmatprep.subr.bf16.mxu1 %v1024_v44 }
 0x23d   :  { %815 = vmatpush3.bf16.msra.mxu0 %v814_v20 }
 0x23e   :  { %816 = vmatprep.subr.bf16.mxu0 %v1024_v44 }
 0x23f   :  { %800 = vmatpush3.bf16.msra.mxu1 %v799_v3 }
 0x240   :  { %801 = vmatprep.subr.bf16.mxu1 %v1024_v44 }
 0x241   :  { %818 = vmatpush3.bf16.msra.mxu0 %v817_v23 }
 0x242   :  { %819 = vmatprep.subr.bf16.mxu0 %v1024_v44 }
 0x243   :  { %803 = vmatpush3.bf16.msra.mxu1 %v802_v6 }
 0x244   :  { %804 = vmatprep.subr.bf16.mxu1 %v1024_v44 }
 0x245   :  { %821 = vmatpush3.bf16.msra.mxu0 %v820_v33 }
 0x246   :  { %822 = vmatprep.subr.bf16.mxu0 %v1024_v44 }
 0x247   :  { %806 = vmatpush3.bf16.msra.mxu1 %v805_v9 }
 0x248   :  { %807 = vmatprep.subr.bf16.mxu1 %v1024_v44 }
 0x249   :  { %824 = vmatpush3.bf16.msra.mxu0 %v823_v36 }
 0x24a   :  { %825 = vmatprep.subr.bf16.mxu0 %v1024_v44 }
 0x24b   :  { %809 = vmatpush3.bf16.msra.mxu1 %v808_v12 }
 0x24d   :  { %827 = vmatpush3.bf16.msra.mxu0 %v826_v39 }
 0x24e   :  { %828 = vmatprep.subr.bf16.mxu0 %v1024_v44 }
 0x251   :  { %830 = vmatpush3.bf16.msra.mxu0 %v829_v42 }
 0x252   :  { %831 = vmatprep.subr.bf16.mxu0 %v1024_v44 }
 0x255   :  { %833 = vmatpush3.bf16.msra.mxu0 %v832_v46 }
 0x30b   :  { %v378_v54 = vpop.f32.mrb[4].mxu0 }
 0x30c   :  { %v379_v55 = vadd.f32 %v378_v54, %v295_v53  ;;  %v714_v56 = vpop.f32.mrb[5].mxu0 }
 0x30d   :  { %v381_v57 = vpop.f32.mrb[6].mxu0 }
 0x30e   :  { %v715_v58 = vpop.f32.mrb[7].mxu0  ;;  %v391_v59 = vsel %vm387_vm2, %v379_v55, -1e+30  ;;  %v400_v61 = vsel %vm1189_vm5, %v379_v55, -1e+30 }
 0x30f   :  { %392 = vmax.xlane.f32.xlu0 %v391_v59 }
 0x313   :  { %401 = vmax.xlane.f32.xlu0 %v400_v61 }
 0x39c   :  { %v393_v24 = vpop.xlane.xlu0 %392 }
 0x39d   :  { %v394_v25 = vsel %vm387_vm2, %v393_v24, 0.0 }
 0x3a0   :  { %v402_v26 = vpop.xlane.xlu0 %401 }
 0x3a1   :  { %v403_v27 = vsel %vm1189_vm5, %v402_v26, %v394_v25 }
 0x3a2   :  { %v404_v28 = vsub.f32 %v379_v55, %v403_v27 }
 0x3a4   :  { %v405_v29 = vmul.f32 1.442695, %v404_v28 }
 0x3a6   :  { %868 = vpow2.f32 %v405_v29 }
 0x3b0   :  { %v869_v30 = vpop.eup %868 }
 0x3b1   :  { %749 = vmatmul.mubr.f32.vlgmr.msra.gmra.mrb[4].mxu1 %v869_v30 }
 0x484   :  { %v493_v49 = vpop.f32.mrb[4].mxu1 }
 0x485   :  { %v494_v50 = vadd.f32 %v493_v49, %v426_v48  ;;  %v750_v51 = vpop.f32.mrb[5].mxu1 }
 0x487   :  { %870 = vrcp.f32 %v494_v50 }
 0x491   :  { %v871_v52 = vpop.eup %870 }
 0x492   :  { %v498_v53 = vmul.f32 %v871_v52, %v494_v50 }
 0x494   :  { %v499_v54 = vsub.f32 2.0, %v498_v53 }
 0x496   :  { %v500_v55 = vmul.f32 %v871_v52, %v499_v54 }
 0x498   :  { %784 = vmatmul.mubr.f32.vlgmr.msra.gmra.mrb[8].mxu0 %v500_v55 }
 0x56b   :  { %v583_v56 = vpop.f32.mrb[8].mxu0 }
 0x56c   :  { %v587_v57 = vmul.f32 %v869_v30, %v583_v56  ;;  %v785_v44 = vpop.f32.mrb[9].mxu0 }
 0x56e   :  { %v588_v58 = vpack.c.bf16 %v587_v57, %v587_v57 }
 0x570   :  { %589 = vst [vmem:[%s1221_s7] sm:$0xf] %v588_v58 }
 0x571   :  { %594 = vsyncpa [#allocation3], 1 }
 0x572   :  { %595 = vsyncpa [#allocation5], 1 }
 0x573   :  { %596 = vsyncpa [#allocation8], 1 }
 0x574   :  { %597 = vsyncpa [#allocation11], 1 }

</bundles_post_ra>
